<compile_context>
chip_gen: v7x
topology: tpu7x:2x2x1
jax: 0.10.0
libtpu: 0.0.40
codegen_flags: <defaults>
</compile_context>

<pallas_src>
import math

import jax
import jax.numpy as jnp
from jax.experimental import pallas as pl
from jax.experimental.pallas import tpu as pltpu


# ---- Problem sizes (small, consistent with the module) -----------------------
CARDINALITIES = [3, 10, 5, 7]          # 4 categorical features
N_OBJECTS = 8                          # batch (n_objects)
N_FEATURES = len(CARDINALITIES)
D_TOKEN = 32
VOCAB = sum(CARDINALITIES)             # 25 rows in the fused embedding table


# ---- Pallas kernel ------------------------------------------------------------
def tokenizer_kernel(idx_ref, off_ref, w_ref, out_ref):
    # idx_ref: (B, F) int32  raw categorical indices
    # off_ref: (1, F) int32  category offsets
    # w_ref:   (V+F, F*D) f32  block-diagonal embedding table + F bias rows
    # out_ref: (B, F*D) f32    lane-dense output slab (one vreg at these sizes)
    b, f = idx_ref.shape
    vp = w_ref.shape[0]          # V + F
    v = vp - f                   # V

    # x + category_offsets: (8,4) + (1,4) sublane broadcast, free on the VPU.
    fidx = idx_ref[...] + off_ref[...]                                  # (B, F)

    # Multi-hot (B, V+F): one 1.0 per feature block (the gather) plus F always-on
    # bias lanes [V, V+F).  F is tiny and static -> unrolled VPU compares/adds.
    lane = jax.lax.broadcasted_iota(jnp.int32, (b, vp), 1)              # (B, V+F)
    multi = ((lane >= v) & (lane < vp)).astype(w_ref.dtype)             # bias lanes
    for j in range(f):                                                  # static unroll
        multi = multi + (lane == fidx[:, j:j + 1]).astype(w_ref.dtype)

    # One MXU matmul does the embedding gather AND the bias add; exact for 0/1
    # weights in f32.  Result is lane-dense -> single unmasked vector store.
    out_ref[...] = jnp.dot(multi, w_ref[...],
                           preferred_element_type=jnp.float32)


# ---- Wrapper -------------------------------------------------------------------
def categorical_feature_tokenizer(x, emb_weight, bias, cardinalities):
    """x: (B, F) int; emb_weight: (V, D); bias: (F, D); cardinalities: python list."""
    b, f = x.shape
    v, d = emb_weight.shape
    assert f == len(cardinalities) and v == sum(cardinalities)

    # category_offsets = cumsum([0] + cardinalities[:-1])  (static python ints)
    offsets = [0]
    for c in cardinalities[:-1]:
        offsets.append(offsets[-1] + c)

    # One-time parameter prep (pure layout): block-diagonal weight with bias rows.
    #   rows [off_j, off_j + card_j), cols [j*D, (j+1)*D)  <- feature j's embeddings
    #   row  V + j,                   cols [j*D, (j+1)*D)  <- feature j's bias
    w = jnp.zeros((v + f, f * d), dtype=jnp.float32)
    for j, (o, c) in enumerate(zip(offsets, cardinalities)):
        w = w.at[o:o + c, j * d:(j + 1) * d].set(emb_weight[o:o + c].astype(jnp.float32))
        w = w.at[v + j, j * d:(j + 1) * d].set(bias[j].astype(jnp.float32))

    idx = x.astype(jnp.int32)                              # (B, F)   single small input
    off = jnp.asarray(offsets, dtype=jnp.int32)[None, :]   # (1, F)   16 bytes

    vmem = pl.BlockSpec(memory_space=pltpu.MemorySpace.VMEM)
    out = pl.pallas_call(
        tokenizer_kernel,
        out_shape=jax.ShapeDtypeStruct((b, f * d), jnp.float32),
        in_specs=[vmem, vmem, vmem],
        out_specs=vmem,
    )(idx, off, w)

    # (B, F*D) -> (B, F, D): same row-major data; free reshape in the wrapper.
    return out.reshape(b, f, d)


# ---- Pure-JAX reference (sanity check) ------------------------------------------
def reference(x, emb_weight, bias, category_offsets):
    idx = x + category_offsets[None, :]
    return emb_weight[idx] + bias[None]


# ---- Main ------------------------------------------------------------------------
if __name__ == "__main__":
    key = jax.random.PRNGKey(0)
    keys = jax.random.split(key, 2 + N_FEATURES)
    k_emb, k_bias, k_feat = keys[0], keys[1], keys[2:]

    # 'uniform' initialization from the module: U(-1/sqrt(d), 1/sqrt(d))
    s = 1.0 / math.sqrt(D_TOKEN)
    emb_weight = jax.random.uniform(k_emb, (VOCAB, D_TOKEN), jnp.float32, -s, s)
    bias = jax.random.uniform(k_bias, (N_FEATURES, D_TOKEN), jnp.float32, -s, s)

    # category_offsets for the reference
    offs = [0]
    for c in CARDINALITIES[:-1]:
        offs.append(offs[-1] + c)
    category_offsets = jnp.array(offs, dtype=jnp.int32)

    # Deterministic categorical inputs: column j in [0, cardinalities[j])
    cols = [jax.random.randint(k_feat[j], (N_OBJECTS,), 0, CARDINALITIES[j])
            for j in range(N_FEATURES)]
    x = jnp.stack(cols, axis=1).astype(jnp.int32)            # (B, F)

    tokens = categorical_feature_tokenizer(x, emb_weight, bias, CARDINALITIES)
    tokens = jax.block_until_ready(tokens)

    ref = reference(x, emb_weight, bias, category_offsets)
    assert tokens.shape == (N_OBJECTS, N_FEATURES, D_TOKEN)
    assert jnp.allclose(tokens, ref, atol=1e-6, rtol=1e-6)

    print("KERNEL_OK")
</pallas_src>

<mosaic_0001>
module attributes {stable_mosaic.version = 11 : i64} {
  func.func @tokenizer_kernel(%arg0: memref<8x4xi32, #tpu.memory_space<vmem>>, %arg1: memref<1x4xi32, #tpu.memory_space<vmem>>, %arg2: memref<29x128xf32, #tpu.memory_space<vmem>>, %arg3: memref<8x128xf32, #tpu.memory_space<vmem>>) attributes {dimension_semantics = [], scalar_prefetch = 0 : i64, scratch_operands = 0 : i64, tpu.core_type = #tpu.core_type<tc>} {
    %c0 = arith.constant 0 : index
    %c0_0 = arith.constant 0 : index
    %0 = vector.load %arg0[%c0, %c0_0] : memref<8x4xi32, #tpu.memory_space<vmem>>, vector<8x4xi32>
    %c0_1 = arith.constant 0 : index
    %c0_2 = arith.constant 0 : index
    %1 = vector.load %arg1[%c0_1, %c0_2] : memref<1x4xi32, #tpu.memory_space<vmem>>, vector<1x4xi32>
    %2 = vector.broadcast %1 : vector<1x4xi32> to vector<8x4xi32>
    %3 = arith.addi %0, %2 : vector<8x4xi32>
    %4 = tpu.iota {dimensions = array<i32: 1>} : vector<8x29xi32>
    %c25_i32 = arith.constant 25 : i32
    %5 = vector.broadcast %c25_i32 : i32 to vector<8x29xi32>
    %6 = arith.cmpi sge, %4, %5 : vector<8x29xi32>
    %c29_i32 = arith.constant 29 : i32
    %7 = vector.broadcast %c29_i32 : i32 to vector<8x29xi32>
    %8 = arith.cmpi slt, %4, %7 : vector<8x29xi32>
    %9 = arith.andi %6, %8 : vector<8x29xi1>
    %10 = arith.extui %9 : vector<8x29xi1> to vector<8x29xi32>
    %11 = arith.sitofp %10 : vector<8x29xi32> to vector<8x29xf32>
    %12 = vector.extract_strided_slice %3 {offsets = [0, 0], sizes = [8, 1], strides = [1, 1]} : vector<8x4xi32> to vector<8x1xi32>
    %13 = vector.broadcast %12 : vector<8x1xi32> to vector<8x29xi32>
    %14 = arith.cmpi eq, %4, %13 : vector<8x29xi32>
    %15 = arith.extui %14 : vector<8x29xi1> to vector<8x29xi32>
    %16 = arith.sitofp %15 : vector<8x29xi32> to vector<8x29xf32>
    %17 = arith.addf %11, %16 : vector<8x29xf32>
    %18 = vector.extract_strided_slice %3 {offsets = [0, 1], sizes = [8, 1], strides = [1, 1]} : vector<8x4xi32> to vector<8x1xi32>
    %19 = vector.broadcast %18 : vector<8x1xi32> to vector<8x29xi32>
    %20 = arith.cmpi eq, %4, %19 : vector<8x29xi32>
    %21 = arith.extui %20 : vector<8x29xi1> to vector<8x29xi32>
    %22 = arith.sitofp %21 : vector<8x29xi32> to vector<8x29xf32>
    %23 = arith.addf %17, %22 : vector<8x29xf32>
    %24 = vector.extract_strided_slice %3 {offsets = [0, 2], sizes = [8, 1], strides = [1, 1]} : vector<8x4xi32> to vector<8x1xi32>
    %25 = vector.broadcast %24 : vector<8x1xi32> to vector<8x29xi32>
    %26 = arith.cmpi eq, %4, %25 : vector<8x29xi32>
    %27 = arith.extui %26 : vector<8x29xi1> to vector<8x29xi32>
    %28 = arith.sitofp %27 : vector<8x29xi32> to vector<8x29xf32>
    %29 = arith.addf %23, %28 : vector<8x29xf32>
    %30 = vector.extract_strided_slice %3 {offsets = [0, 3], sizes = [8, 1], strides = [1, 1]} : vector<8x4xi32> to vector<8x1xi32>
    %31 = vector.broadcast %30 : vector<8x1xi32> to vector<8x29xi32>
    %32 = arith.cmpi eq, %4, %31 : vector<8x29xi32>
    %33 = arith.extui %32 : vector<8x29xi1> to vector<8x29xi32>
    %34 = arith.sitofp %33 : vector<8x29xi32> to vector<8x29xf32>
    %35 = arith.addf %29, %34 : vector<8x29xf32>
    %c0_3 = arith.constant 0 : index
    %c0_4 = arith.constant 0 : index
    %36 = vector.load %arg2[%c0_3, %c0_4] : memref<29x128xf32, #tpu.memory_space<vmem>>, vector<29x128xf32>
    %cst = arith.constant dense<0.000000e+00> : vector<8x128xf32>
    %37 = tpu.matmul %35, %36, %cst {dimension_numbers = #tpu.dot_dimension_numbers<[1], [0], [0], [1], [0, 0, 1, 1], [], []>} : vector<8x29xf32>, vector<29x128xf32>, vector<8x128xf32> -> vector<8x128xf32>
    %c0_5 = arith.constant 0 : index
    %c0_6 = arith.constant 0 : index
    %38 = vector.load %arg3[%c0_5, %c0_6] : memref<8x128xf32, #tpu.memory_space<vmem>>, vector<8x128xf32>
    tpu.vector_store %arg3[%c0_5, %c0_6], %37 {strides = array<i32>} : memref<8x128xf32, #tpu.memory_space<vmem>>, vector<8x128xf32>,
    return
  }
}

</mosaic_0001>

<bundles_post_ra>
// kernel: tpu_custom_call.1
= control target key start
LH: loop header
LB: loop body
LE: loop exit
PB: predicated region body
PF: predicated region fallthrough
CT: control target
= control target key end

     0   :  { %8 = vsyncpa [#allocation3], 0  ;;  %s327_s0 = inlined_call_operand.vmem [shape: s32[8,4], index: 0, kind: input, shape index: {}]   ;;  %s328_s1 = inlined_call_operand.vmem [shape: s32[1,4], index: 1, kind: input, shape index: {}]   ;;  %s329_s2 = inlined_call_operand.hbm [shape: f32[29,128], index: 2, kind: input, shape index: {}]   ;;  %s330_s3 = inlined_call_operand.hbm [shape: f32[8,128], index: 3, kind: output, shape index: {}]  }
   0x1   :  { %9 = vsyncpa [#allocation4], 0  ;;  %s265_s12 = smov [#allocation2]   ;;  %s217_s16 = scalar_lea.hbm %s329_s2, 512 }
   0x2   :  { %s19_s13 = sshll.u32 %s265_s12, 4  ;;  %p218_p0 = scmp.ne.s32.totalorder %s329_s2, %s217_s16  ;;  %s20_s13 = int_to_ptr.vmem [resolvable:$true] %s19_s13 }
   0x3   :  { %p221_p1 = scmp.lt.u32.totalorder %s217_s16, %s329_s2 }
   0x5   :  { %p223_p2 = pnand %p221_p1, %p218_p0 }
   0x7   :  { %226 = shalt.err (!%p223_p2)
}
   0x8   :  { %s227_s21 = scalar_lea.vmem %s20_s13, 512  ;;  %p232_p4 = scmp.lt.s32.totalorder %s20_s13, %s20_s13 }
   0x9   :  { %p228_p3 = scmp.ne.s32.totalorder %s20_s13, %s227_s21  ;;  %p233_p5 = scmp.lt.s32.totalorder %s227_s21, %s227_s21 }
   0xb   :  { %p234_p6 = por %p233_p5, %p232_p4 }
   0xd   :  { %p235_p7 = pnand %p234_p6, %p228_p3 }
   0xf   :  { %238 = shalt.err (!%p235_p7)
}
  0x10   :  { %s266_s22 = smov 128   ;;  %s267_s23 = smov 8  }
  0x11   :  { %25 = dma.hbm_to_vmem [thread:$0]  %s329_s2, 512, %s20_s13, [#allocation3], %s266_s22, %s266_s22, %s267_s23  }
  0x12   :  { %261 = dma.done.wait [#allocation3], 512  }
  0x13   :  { %262 = vsyncadd [#allocation3], 4294966784  ;;  %v268_v0 = vmov 0   ;;  %v269_v1 = vmov 2   ;;  %v29_v2 = vld [vmem:[%s327_s0] sm:$0xff]  ;;  %v71_v5 = vld [vmem:[#allocation2] sm:$0xff]  ;;  %v36_v15 = vlaneseq }
  0x14   :  { %212 = vset.pattern.permute.xlu0 %v268_v0  ;;  %214 = vset.pattern.permute.xlu1 %v269_v1  ;;  %v169_v3 = vld [vmem:[%s328_s1] ss:$0 sm:$0xff]  ;;  %v72_v6 = vld [vmem:[#allocation2 + $0x8] sm:$0xff]  ;;  %v270_v7 = vmov 1   ;;  %v271_v8 = vmov 3   ;;  %v272_v10 = vmov 0.0|0.0  }
  0x15   :  { %v35_v4 = vadd.s32 %v169_v3, %v29_v2  ;;  %v194_v9 = vpack.c.bf16 %v72_v6, %v71_v5  ;;  %193 = vmatprep.subr.bf16.mxu0 %v272_v10  ;;  %v73_v11 = vld [vmem:[#allocation2 + $0x10] sm:$0xff]  ;;  %v74_v12 = vld [vmem:[#allocation2 + $0x18] sm:$0x1f]  ;;  %vm79_vm0 = vcmask 1044480   ;;  %vm273_vm1 = vmmov 1   ;;  %s276_s0 = smov [#allocation5]  }
  0x16   :  { %v197_v13 = vpack.c.bf16 %v74_v12, %v73_v11  ;;  %vm198_vm2 = vmpackc.low %vm79_vm0, %vm273_vm1  ;;  %vm274_vm3 = vmmov 0   ;;  %v275_v14 = vmov 0.0   ;;  %v37_v16 = vand.u32 127, %v36_v15  ;;  %s160_s1 = sshll.u32 %s276_s0, 4  ;;  %s161_s1 = int_to_ptr.vmem [resolvable:$true] %s160_s1 }
  0x17   :  { %44 = vperm.xlu0 %212, %v35_v4   ;;  %58 = vperm.xlu1 %214, %v35_v4   ;;  %vm75_vm11 = vcmask 236544   ;;  %s239_s2 = scalar_lea.vmem %s161_s1, 128  ;;  %p244_p9 = scmp.lt.s32.totalorder %s161_s1, %s161_s1 }
  0x18   :  { %195 = vmatpush3.bf16.msra.mxu0 %v194_v9  ;;  %190 = vmatprep.mubr.msk.f32.mxu0 %vm274_vm3, %v275_v14  ;;  %vm38_vm4 = vcmp.ge.s32.totalorder %v37_v16, 25  ;;  %vm39_vm5 = vcmp.lt.s32.totalorder %v37_v16, 29  ;;  %p240_p8 = scmp.ne.s32.totalorder %s161_s1, %s239_s2  ;;  %p245_p10 = scmp.lt.s32.totalorder %s239_s2, %s239_s2 }
  0x19   :  { %196 = vmatprep.subr.bf16.mxu0 %v272_v10  ;;  %vm40_vm6 = vmand %vm38_vm4, %vm39_vm5 }
  0x1a   :  { %v170_v19 = vsel %vm40_vm6, 1.0, %v275_v14  ;;  %p246_p11 = por %p245_p10, %p244_p9 }
  0x1b   :  { %213 = vset.pattern.permute.xlu0 %v270_v7  ;;  %215 = vset.pattern.permute.xlu1 %v271_v8 }
  0x1c   :  { %51 = vperm.xlu0 %213, %v35_v4   ;;  %65 = vperm.xlu1 %215, %v35_v4   ;;  %p247_p12 = pnand %p246_p11, %p240_p8 }
  0x1d   :  { %199 = vmatpush3.bf16.msk.msra.mxu0 %vm198_vm2, %v197_v13 }
  0x20   :  { %216 = vset.pattern.permute.xlu0 %v271_v8 }
  0x96   :  { %v45_v17 = vpop.permute.xlu0 %44  ;;  %v59_v18 = vpop.permute.xlu1 %58 }
  0x97   :  { %vm46_vm7 = vcmp.eq.s32.totalorder %v37_v16, %v45_v17  ;;  %vm60_vm8 = vcmp.eq.s32.totalorder %v37_v16, %v59_v18 }
  0x98   :  { %v171_v20 = vsel %vm46_vm7, 1.0, %v275_v14  ;;  %v173_v26 = vsel %vm60_vm8, 1.0, %v275_v14 }
  0x99   :  { %v49_v23 = vadd.f32 %v171_v20, %v170_v19 }
  0x9b   :  { %v52_v21 = vpop.permute.xlu0 %51  ;;  %v66_v22 = vpop.permute.xlu1 %65 }
  0x9c   :  { %vm53_vm9 = vcmp.eq.s32.totalorder %v37_v16, %v52_v21  ;;  %vm67_vm10 = vcmp.eq.s32.totalorder %v37_v16, %v66_v22 }
  0x9d   :  { %v172_v24 = vsel %vm53_vm9, 1.0, %v275_v14  ;;  %v174_v27 = vsel %vm67_vm10, 1.0, %v275_v14 }
  0x9e   :  { %v56_v25 = vadd.f32 %v172_v24, %v49_v23 }
  0xa0   :  { %v63_v28 = vadd.f32 %v173_v26, %v56_v25 }
  0xa2   :  { %v70_v29 = vadd.f32 %v174_v27, %v63_v28 }
  0xa4   :  { %191 = vmatmul.mubr.msk.f32.vlgmr.msra.gmra.mrb[0].mxu0 %vm75_vm11, %v70_v29 }
 0x177   :  { %v149_v30 = vpop.f32.mrb[0].mxu0 }
 0x178   :  { %153 = vst [vmem:[#allocation5] sm:$0xff] %v149_v30  ;;  %v192_v31 = vpop.f32.mrb[1].mxu0 }
 0x179   :  { %250 = shalt.err (!%p247_p12)
}
 0x17a   :  { %s251_s5 = scalar_lea.hbm %s330_s3, 128 }
 0x17b   :  { %p252_p13 = scmp.ne.s32.totalorder %s330_s3, %s251_s5  ;;  %p255_p0 = scmp.lt.u32.totalorder %s251_s5, %s330_s3 }
 0x17d   :  { %p257_p1 = pnand %p255_p0, %p252_p13 }
 0x17f   :  { %260 = shalt.err (!%p257_p1)
}
 0x180   :  { %163 = dma.vmem_to_hbm [thread:$0]  %s161_s1, 128, %s330_s3, [#allocation4]  }
 0x181   :  { %263 = dma.done.wait [#allocation4], 128  }
 0x182   :  { %264 = vsyncadd [#allocation4], 4294967168 }
 0x183   :  { %167 = vsyncpa [#allocation3], 1 }
 0x184   :  { %168 = vsyncpa [#allocation4], 1 }

</bundles_post_ra>
